<compile_context>
chip_gen: v7x
topology: tpu7x:2x2x1
jax: 0.10.0
libtpu: 0.0.40
codegen_flags: <defaults>
</compile_context>

<pallas_src>
import functools

import jax
import jax.numpy as jnp
from jax import lax
from jax.experimental import pallas as pl
from jax.experimental.pallas import tpu as pltpu


_LANE = 128
_V7X_SAFE_VMEM = 48 * 1024 * 1024   # stay well under v7x's 64 MiB physical VMEM


def _round_up(a: int, b: int) -> int:
    return (a + b - 1) // b * b


def _conv1o1_kernel(x_ref, wn_ref, o_ref, *, scale_after: bool):
    """x_ref: (TM, C) f32 pixel rows; wn_ref: (C, O_pad) pre-normalized weights
    (bf16 or f32); o_ref: (TM, O_pad) f32."""
    x = x_ref[...].astype(jnp.float32)

    # 1/||x|| per row.  rsqrt goes to the EUP (its own VLIW slot); zero rows get
    # scale 1.0, matching the torch `xnorm + (xnorm == 0)` guard.
    ss = jnp.sum(x * x, axis=1, keepdims=True)               # (TM, 1)
    inv = jnp.where(ss == 0.0, 1.0, lax.rsqrt(ss))

    wn = wn_ref[...]                                          # already L2-normalized
    if scale_after:
        # O_pad < C: cheaper to scale the (TM, O_pad) result than the (TM, C) input.
        acc = jnp.dot(x.astype(wn.dtype), wn, preferred_element_type=jnp.float32)
        o_ref[...] = (acc * inv).astype(o_ref.dtype)
    else:
        xn = (x * inv).astype(wn.dtype)
        o_ref[...] = jnp.dot(xn, wn, preferred_element_type=jnp.float32).astype(
            o_ref.dtype
        )


def conv1o1_rows(x_rows, weight_oc, *, tm=1024, use_bf16=True):
    """x_rows: (M, C) f32 pixel rows (channels-last); weight_oc: (O, C) f32.
    Returns (M, O) f32 == rows of Conv1o1Layer output."""
    M, C = x_rows.shape
    O = weight_oc.shape[0]
    O_pad = _round_up(O, _LANE)          # lane-dense output tiles (no vst.msk)
    mxu_itemsize = 2 if use_bf16 else 4
    mxu_dtype = jnp.bfloat16 if use_bf16 else jnp.float32

    # --- weight normalization hoisted out of the kernel (tiny: O*C elements) ---
    # No zero-norm guard, matching torch (an all-zero filter yields NaN/Inf).
    w = weight_oc.astype(jnp.float32)
    wn = w / jnp.sqrt(jnp.sum(w * w, axis=1, keepdims=True))
    wn_t = jnp.zeros((C, O_pad), jnp.float32).at[:, :O].set(wn.T).astype(mxu_dtype)

    # --- row-tile sizing ---
    # Big enough to amortize the ~0.35us/grid-step overhead, small enough that
    # double-buffered tiles + temporaries fit a v7x-safe VMEM budget, and >= 2
    # grid steps when there is enough work so v7x megacore can shard the M axis.
    per_row_bytes = 4 * C + 4 * O_pad + mxu_itemsize * (C + O_pad)
    tm_cap = max(128, (_V7X_SAFE_VMEM // (3 * per_row_bytes)) // 8 * 8)
    tm_eff = min(_round_up(max(tm, 8), 8), tm_cap)
    if M >= 2 * 128:
        tm_eff = min(tm_eff, max(128, _round_up(pl.cdiv(M, 2), 8)))
    else:
        tm_eff = min(tm_eff, max(8, _round_up(M, 8)))

    grid_m = pl.cdiv(M, tm_eff)
    m_pad = grid_m * tm_eff
    if m_pad != M:
        # Zero rows have norm 0 -> guarded scale 1 -> zero output rows (sliced off).
        x_rows = jnp.pad(x_rows, ((0, m_pad - M), (0, 0)))

    # Scale whichever side of the matmul is cheaper.
    scale_after = O_pad < C

    # Explicit scoped-VMEM budget: >= default 32 MiB, <= v7x-safe 48 MiB.
    tile_bytes = tm_eff * per_row_bytes
    w_bytes = C * O_pad * mxu_itemsize
    vmem_limit = int(
        min(_V7X_SAFE_VMEM, max(32 * 1024 * 1024, 3 * tile_bytes + 2 * w_bytes + (2 << 20)))
    )

    out_rows = pl.pallas_call(
        functools.partial(_conv1o1_kernel, scale_after=scale_after),
        out_shape=jax.ShapeDtypeStruct((m_pad, O_pad), jnp.float32),
        grid_spec=pltpu.PrefetchScalarGridSpec(
            num_scalar_prefetch=0,
            grid=(grid_m,),
            in_specs=[
                pl.BlockSpec((tm_eff, C), lambda i: (i, 0)),    # pixel-row tile
                pl.BlockSpec((C, O_pad), lambda i: (0, 0)),     # full (small) weight
            ],
            out_specs=pl.BlockSpec((tm_eff, O_pad), lambda i: (i, 0)),
        ),
        compiler_params=pltpu.CompilerParams(
            dimension_semantics=("parallel",),
            vmem_limit_bytes=vmem_limit,
        ),
    )(x_rows, wn_t)

    return out_rows[:M, :O]


def conv1o1_forward(x_nchw, weight_oc11, *, tm=1024, use_bf16=True):
    """x_nchw: (N, C, H, W) f32; weight_oc11: (O, C, 1, 1) f32.
    Returns (N, O, H, W) f32, matching Conv1o1Layer.forward."""
    N, C, H, W = x_nchw.shape
    O = weight_oc11.shape[0]

    # Layout glue only (see TODO at top of file about going NHWC end-to-end).
    x_rows = jnp.transpose(x_nchw, (0, 2, 3, 1)).reshape(N * H * W, C)
    out_rows = conv1o1_rows(x_rows, weight_oc11.reshape(O, C), tm=tm, use_bf16=use_bf16)
    return jnp.transpose(out_rows.reshape(N, H, W, O), (0, 3, 1, 2))


def _reference(x_nchw, weight_oc11):
    xnorm = jnp.sqrt(jnp.sum(x_nchw * x_nchw, axis=1, keepdims=True))
    xnorm = xnorm + (xnorm == 0.0).astype(jnp.float32)
    xn = x_nchw / xnorm
    w = weight_oc11[..., 0, 0]  # (O, C)
    wnorm = jnp.sqrt(jnp.sum(w * w, axis=1, keepdims=True))
    wn = w / wnorm
    return jnp.einsum("nchw,oc->nohw", xn, wn)


if __name__ == "__main__":
    key = jax.random.PRNGKey(0)
    kx, kw = jax.random.split(key)

    N, C, H, W = 2, 4, 16, 16   # small NCHW input
    O = 8                       # number of vMF kernels (1x1 filters)

    x = jax.random.normal(kx, (N, C, H, W), dtype=jnp.float32)
    # Plant a couple of all-zero pixel vectors to exercise the zero-norm guard.
    x = x.at[0, :, 0, 0].set(0.0)
    x = x.at[1, :, 3, 5].set(0.0)

    weight = jax.random.normal(kw, (O, C, 1, 1), dtype=jnp.float32)

    ref = _reference(x, weight)

    # bf16-fed MXU path (default; f32 accumulate) -> loosened tolerance.
    out_bf16 = jax.block_until_ready(conv1o1_forward(x, weight, use_bf16=True))
    assert out_bf16.shape == (N, O, H, W)
    assert not bool(jnp.any(jnp.isnan(out_bf16)))
    assert jnp.allclose(out_bf16, ref, atol=3e-2, rtol=3e-2)

    # Exact f32 path for a tight numerical check.
    out_f32 = jax.block_until_ready(conv1o1_forward(x, weight, use_bf16=False))
    assert out_f32.shape == (N, O, H, W)
    assert not bool(jnp.any(jnp.isnan(out_f32)))
    assert jnp.allclose(out_f32, ref, atol=1e-4, rtol=1e-4)

    print("KERNEL_OK")
</pallas_src>

<mosaic_0001>
module attributes {stable_mosaic.version = 11 : i64} {
  func.func @_conv1o1_kernel(%arg0: i32, %arg1: memref<256x4xf32, #tpu.memory_space<vmem>>, %arg2: memref<4x128xbf16, #tpu.memory_space<vmem>>, %arg3: memref<256x128xf32, #tpu.memory_space<vmem>>) attributes {dimension_semantics = [#tpu.dimension_semantics<parallel>], iteration_bounds = array<i64: 2>, scalar_prefetch = 0 : i64, scratch_operands = 0 : i64, tpu.core_type = #tpu.core_type<tc>, window_params = [{transform_indices = @transform_0, window_bounds = array<i64: 256, 4>}, {pipeline_mode = #tpu.pipeline_mode<synchronous>, transform_indices = @transform_1, window_bounds = array<i64: 4, 128>}, {transform_indices = @transform_2, window_bounds = array<i64: 256, 128>}]} {
    %c0 = arith.constant 0 : index
    %c0_0 = arith.constant 0 : index
    %0 = vector.load %arg1[%c0, %c0_0] : memref<256x4xf32, #tpu.memory_space<vmem>>, vector<256x4xf32>
    %1 = arith.mulf %0, %0 : vector<256x4xf32>
    %cst = arith.constant dense<0.000000e+00> : vector<256xf32>
    %2 = vector.multi_reduction <add>, %1, %cst [1] : vector<256x4xf32> to vector<256xf32>
    %3 = vector.shape_cast %2 : vector<256xf32> to vector<256x1xf32>
    %cst_1 = arith.constant 0.000000e+00 : f32
    %4 = vector.broadcast %cst_1 : f32 to vector<256x1xf32>
    %5 = arith.cmpf oeq, %3, %4 : vector<256x1xf32>
    %6 = math.rsqrt %3 : vector<256x1xf32>
    %cst_2 = arith.constant 1.000000e+00 : f32
    %7 = vector.broadcast %cst_2 : f32 to vector<256x1xf32>
    %8 = arith.select %5, %7, %6 : vector<256x1xi1>, vector<256x1xf32>
    %c0_3 = arith.constant 0 : index
    %c0_4 = arith.constant 0 : index
    %9 = vector.load %arg2[%c0_3, %c0_4] : memref<4x128xbf16, #tpu.memory_space<vmem>>, vector<4x128xbf16>
    %10 = vector.broadcast %8 : vector<256x1xf32> to vector<256x4xf32>
    %11 = arith.mulf %0, %10 : vector<256x4xf32>
    %12 = arith.truncf %11 : vector<256x4xf32> to vector<256x4xbf16>
    %cst_5 = arith.constant dense<0.000000e+00> : vector<256x128xf32>
    %13 = tpu.matmul %12, %9, %cst_5 {dimension_numbers = #tpu.dot_dimension_numbers<[1], [0], [0], [1], [0, 0, 1, 1], [], []>} : vector<256x4xbf16>, vector<4x128xbf16>, vector<256x128xf32> -> vector<256x128xf32>
    %c0_6 = arith.constant 0 : index
    %c0_7 = arith.constant 0 : index
    %14 = vector.load %arg3[%c0_6, %c0_7] : memref<256x128xf32, #tpu.memory_space<vmem>>, vector<256x128xf32>
    tpu.vector_store %arg3[%c0_6, %c0_7], %13 {strides = array<i32>} : memref<256x128xf32, #tpu.memory_space<vmem>>, vector<256x128xf32>,
    return
  }
  func.func @transform_0(%arg0: i32) -> (i32, i32) {
    %c0_i32 = arith.constant 0 : i32
    %c0_i32_0 = arith.constant 0 : i32
    return %arg0, %c0_i32 : i32, i32
  }
  func.func @transform_1(%arg0: i32) -> (i32, i32) {
    %c0_i32 = arith.constant 0 : i32
    %c0_i32_0 = arith.constant 0 : i32
    %c0_i32_1 = arith.constant 0 : i32
    return %c0_i32, %c0_i32_0 : i32, i32
  }
  func.func @transform_2(%arg0: i32) -> (i32, i32) {
    %c0_i32 = arith.constant 0 : i32
    %c0_i32_0 = arith.constant 0 : i32
    return %arg0, %c0_i32 : i32, i32
  }
}

</mosaic_0001>

<bundles_post_ra>
// kernel: tpu_custom_call.1
= control target key start
LH: loop header
LB: loop body
LE: loop exit
PB: predicated region body
PF: predicated region fallthrough
CT: control target
= control target key end

     0   :  { %7 = vsyncpa [#allocation3], 0  ;;  %s1430_s0 = inlined_call_operand.vmem [shape: f32[512,4], index: 0, kind: input, shape index: {}]   ;;  %s1431_s1 = inlined_call_operand.vmem [shape: bf16[4,128], index: 1, kind: input, shape index: {}]   ;;  %s1432_s2 = inlined_call_operand.hbm [shape: f32[512,128], index: 2, kind: output, shape index: {}]  }
   0x1   :  { %9 = vsyncpa [#allocation3 + $0x1], 0  ;;  %s1044_s9 = smov 0   ;;  %s1046_s10 = smov 0  }
   0x2   :  { %s1048_s11 = smov 0   ;;  %s1050_s12 = smov 0  }
   0x3 LB: > { %s1065_s13 = sadd.s32 4294967295, %s1024_s12   ;;  %s773_s14 = sadd.s32 4294967294, %s1024_s12   ;;  %s1024_s12 = sphi %s1050_s12, %s1438_s12   ;;  %s1020_s11 = sphi %s1048_s11, %s1437_s11   ;;  %s1016_s10 = sphi %s1046_s10, %s1436_s10   ;;  %s1012_s9 = sphi %s1044_s9, %s1435_s9  }
   0x4   : > { %s1069_s15 = sadd.s32 1, %s1024_s12   ;;  %s69_s16 = sadd.s32 1, %s1020_s11 }
   0x5   : > { %s66_s17 = ssub.s32 %s1024_s12, %s1069_s15  ;;  %p79_p0 = scmp.ne.s32.totalorder %s1020_s11, %s1016_s10 }
   0x6   : > { %p67_p1 = scmp.eq.s32.totalorder %s66_s17, 0  ;;  %p80_p2 = scmp.eq.s32.totalorder %s1065_s13, 1 }
   0x7   : > { %p85_p3 = scmp.ne.s32.totalorder %s1016_s10, %s1012_s9  ;;  %p86_p4 = scmp.eq.s32.totalorder %s773_s14, 1 }
   0x8   : > { %s1080_s18 = scalar_select %p67_p1, %s1020_s11, %s69_s16  }
   0x9   : > { %p1082_p5 = por %p80_p2, %p79_p0  ;;  %p1086_p6 = por %p86_p4, %p85_p3 }
   0xa   : > { %p776_p7 = scmp.ge.s32.totalorder %s1024_s12, 1  ;;  %p116_p8 = scmp.lt.s32.totalorder %s1024_s12, 3 }
   0xc   : > { %p117_p9 = pnand %p776_p7, %p116_p8 }
   0xd   : > { %s778_s21 = sshll.u32 (!%p117_p9), %s1065_s13, 5  ;;  %vm210_vm0 = vcmask (!%p117_p9), 31744   ;;  %vm500_vm1 = vcmask (!%p117_p9), 1041408   ;;  %s135_s28 = sand.u32 (!%p117_p9), 1, %s1016_s10  }
   0xe   : > { %120 = sbr.rel (%p117_p9) target bundleno = 477 (0x1dd), region = 28  ;;  %p139_p10 = scmp.lt.s32.totalorder (!%p117_p9), %s778_s21, 63 }
   0xf   : > { %s777_s29 = sshll.u32 (!%p117_p9), %s135_s28, 8  ;;  %s801_s3 = sshll.u32 (!%p117_p9), %s1065_s13, 12 }
  0x10   : > { %s1344_s30 = scalar_lea.vmem (!%p117_p9), [#allocation2], %s777_s29  ;;  %s1380_s7 = scalar_lea.hbm (!%p117_p9), %s1432_s2, %s801_s3 }
  0x11   : > { %s711_s4 = sshll.u32 (!%p117_p9), %s1344_s30, 4  ;;  %s1389_s8 = scalar_lea.sflag (!%p117_p9), [#allocation3], %s135_s28  ;;  %s1382_s4 = int_to_ptr.vmem [resolvable:$true] %s711_s4 }
  0x12   : > { %s962_s13 = scalar_lea.vmem (!%p117_p9), %s1382_s4, 4096  ;;  %s1026_s14 = smov (!%p117_p9), [#allocation2]  }
  0x13   : > { %p963_p11 = scmp.ne.s32.totalorder (!%p117_p9), %s1382_s4, %s962_s13  ;;  %s966_s16 = sshll.u32 (!%p117_p9), %s1026_s14, 4  ;;  %s967_s16 = int_to_ptr.vmem [resolvable:$false] %s966_s16 }
  0x14   : > { %s968_s17 = scalar_lea.vmem (!%p117_p9), %s967_s16, 8192  ;;  %p969_p0 = scmp.lt.s32.totalorder (!%p117_p9), %s1382_s4, %s967_s16 }
  0x15   : > { %s1440_s21 = smov (!%p139_p10, %s778_s21), 63  ;;  %p964_p12 = pnand %p963_p11, %p1082_p5 }
  0x16   : > { %s779_s22 = sshll.u32 %s1440_s21, 3  ;;  %p970_p1 = scmp.lt.s32.totalorder %s968_s17, %s962_s13 }
  0x17   : > { %s1096_s25 = scalar_lea.vmem %s1430_s0, %s779_s22  ;;  %p965_p13 = pneg %p964_p12 }
  0x18   : > { %v1099_v0 = vld [vmem:[%s1096_s25 + $0x80] sm:$0xff]  ;;  %v1105_v2 = vld [vmem:[%s1096_s25 + $0x88] sm:$0xff]  ;;  %v1119_v8 = vld [vmem:[%s1096_s25 + $0x18] sm:$0xff]  ;;  %p971_p2 = por %p970_p1, %p969_p0 }
  0x19   : > { %v1102_v1 = vld [vmem:[%s1096_s25] sm:$0xff]  ;;  %v194_v3 = vmul.f32 %v1099_v0, %v1099_v0  ;;  %v195_v5 = vmul.f32 %v1105_v2, %v1105_v2  ;;  %v1114_v6 = vld [vmem:[%s1096_s25 + $0x8] sm:$0xff]  ;;  %v1122_v9 = vld [vmem:[%s1096_s25 + $0x10] sm:$0xff]  ;;  %v181_v14 = vmul.f32 %v1119_v8, %v1119_v8 }
  0x1a   : > { %v178_v4 = vmul.f32 %v1102_v1, %v1102_v1  ;;  %v179_v7 = vmul.f32 %v1114_v6, %v1114_v6  ;;  %v180_v15 = vmul.f32 %v1122_v9, %v1122_v9  ;;  %v1133_v16 = vld [vmem:[%s1096_s25 + $0x98] sm:$0xff]  ;;  %v1136_v17 = vld [vmem:[%s1096_s25 + $0x90] sm:$0xff]  ;;  %v1145_v22 = vld [vmem:[%s1096_s25 + $0x28] sm:$0xff]  ;;  %p972_p3 = pnand %p971_p2, %p965_p13 }
  0x1b   : > { %v259_v10 = vsel %vm210_vm0, %v194_v3, 0.0  ;;  %v262_v12 = vsel %vm210_vm0, %v195_v5, 0.0  ;;  %v220_v18 = vsel %vm210_vm0, %v181_v14, 0.0  ;;  %v197_v20 = vmul.f32 %v1133_v16, %v1133_v16  ;;  %v1148_v23 = vld [vmem:[%s1096_s25 + $0x20] sm:$0xff]  ;;  %v1157_v28 = vld [vmem:[%s1096_s25 + $0xa8] sm:$0xff]  ;;  %v1169_v34 = vld [vmem:[%s1096_s25 + $0x38] sm:$0xff] }
  0x1c   : > { %v211_v11 = vsel %vm210_vm0, %v178_v4, 0.0  ;;  %260 = vadd.xlane.f32.xlu1 %v259_v10  ;;  %v214_v13 = vsel %vm210_vm0, %v179_v7, 0.0  ;;  %v217_v19 = vsel %vm210_vm0, %v180_v15, 0.0  ;;  %v196_v21 = vmul.f32 %v1136_v17, %v1136_v17  ;;  %v1160_v29 = vld [vmem:[%s1096_s25 + $0xa0] sm:$0xff]  ;;  %v1172_v35 = vld [vmem:[%s1096_s25 + $0x30] sm:$0xff]  ;;  %v1181_v40 = vld [vmem:[%s1096_s25 + $0xb8] sm:$0xff] }
  0x1d   : > { %212 = vadd.xlane.f32.xlu0 %v211_v11  ;;  %v268_v24 = vsel %vm210_vm0, %v197_v20, 0.0  ;;  %v183_v26 = vmul.f32 %v1145_v22, %v1145_v22  ;;  %v182_v27 = vmul.f32 %v1148_v23, %v1148_v23  ;;  %v199_v32 = vmul.f32 %v1157_v28, %v1157_v28  ;;  %v1184_v41 = vld [vmem:[%s1096_s25 + $0xb0] sm:$0xff]  ;;  %v1193_v46 = vld [vmem:[%s1096_s25 + $0x48] sm:$0xff]  ;;  %v1196_v47 = vld [vmem:[%s1096_s25 + $0x40] sm:$0xff] }
  0x1e   : > { %v265_v25 = vsel %vm210_vm0, %v196_v21, 0.0  ;;  %v198_v33 = vmul.f32 %v1160_v29, %v1160_v29  ;;  %v185_v38 = vmul.f32 %v1169_v34, %v1169_v34  ;;  %v184_v39 = vmul.f32 %v1172_v35, %v1172_v35  ;;  %v1205_v52 = vld [vmem:[%s1096_s25 + $0xc8] sm:$0xff]  ;;  %v1208_v53 = vld [vmem:[%s1096_s25 + $0xc0] sm:$0xff]  ;;  %v1217_v58 = vld [vmem:[%s1096_s25 + $0x58] sm:$0xff] }
  0x1f   : > { %v226_v30 = vsel %vm210_vm0, %v183_v26, 0.0  ;;  %v223_v31 = vsel %vm210_vm0, %v182_v27, 0.0  ;;  %v274_v36 = vsel %vm210_vm0, %v199_v32, 0.0  ;;  %v201_v44 = vmul.f32 %v1181_v40, %v1181_v40  ;;  %v1220_v59 = vld [vmem:[%s1096_s25 + $0x50] sm:$0xff]  ;;  %v1229_v3 = vld [vmem:[%s1096_s25 + $0xd8] sm:$0xff]  ;;  %v1244_v14 = vld [vmem:[%s1096_s25 + $0x68] sm:$0xff] }
  0x20   : > { %263 = vadd.xlane.f32.xlu1 %v262_v12  ;;  %v271_v37 = vsel %vm210_vm0, %v198_v33, 0.0  ;;  %v232_v42 = vsel %vm210_vm0, %v185_v38, 0.0  ;;  %v229_v43 = vsel %vm210_vm0, %v184_v39, 0.0  ;;  %v200_v45 = vmul.f32 %v1184_v41, %v1184_v41  ;;  %v1232_v4 = vld [vmem:[%s1096_s25 + $0xd0] sm:$0xff]  ;;  %v403_v5 = vld [vmem:[%s1431_s1] sm:$0x3] }
  0x21   : > { %215 = vadd.xlane.f32.xlu0 %v214_v13  ;;  %v280_v48 = vsel %vm210_vm0, %v201_v44, 0.0  ;;  %v187_v50 = vmul.f32 %v1193_v46, %v1193_v46  ;;  %v186_v51 = vmul.f32 %v1196_v47, %v1196_v47  ;;  %v203_v56 = vmul.f32 %v1205_v52, %v1205_v52  ;;  %855 = vmatprep.subr.msk.bf16.mxu0 %vm500_vm1, %v403_v5  ;;  %v1247_v15 = vld [vmem:[%s1096_s25 + $0x60] sm:$0xff]  ;;  %v1268_v32 = vld [vmem:[%s1096_s25 + $0x78] sm:$0xff]  ;;  %v1271_v33 = vld [vmem:[%s1096_s25 + $0x70] sm:$0xff] }
  0x22   : > { %v277_v49 = vsel %vm210_vm0, %v200_v45, 0.0  ;;  %v202_v57 = vmul.f32 %v1208_v53, %v1208_v53  ;;  %v189_v62 = vmul.f32 %v1217_v58, %v1217_v58  ;;  %v188_v63 = vmul.f32 %v1220_v59, %v1220_v59  ;;  %856 = vmatprep.subr.msk.bf16.mxu1 %vm500_vm1, %v403_v5 }
  0x23   : > { %v238_v54 = vsel %vm210_vm0, %v187_v50, 0.0  ;;  %v235_v55 = vsel %vm210_vm0, %v186_v51, 0.0  ;;  %v286_v60 = vsel %vm210_vm0, %v203_v56, 0.0  ;;  %v502_v7 = vsel %vm500_vm1, %v403_v5, 0 }
  0x24   : > { %221 = vadd.xlane.f32.xlu1 %v220_v18  ;;  %v283_v61 = vsel %vm210_vm0, %v202_v57, 0.0  ;;  %v244_v10 = vsel %vm210_vm0, %v189_v62, 0.0  ;;  %v241_v11 = vsel %vm210_vm0, %v188_v63, 0.0  ;;  %v205_v12 = vmul.f32 %v1229_v3, %v1229_v3  ;;  %820 = vmatpush3.bf16.msra.mxu0 %v502_v7 }
  0x25   : > { %218 = vadd.xlane.f32.xlu0 %v217_v19  ;;  %v204_v13 = vmul.f32 %v1232_v4, %v1232_v4  ;;  %854 = vmatpush3.bf16.msra.mxu1 %v502_v7  ;;  %v191_v20 = vmul.f32 %v1244_v14, %v1244_v14  ;;  %v190_v21 = vmul.f32 %v1247_v15, %v1247_v15 }
  0x26   : > { %v292_v18 = vsel %vm210_vm0, %v205_v12, 0.0  ;;  %v193_v38 = vmul.f32 %v1268_v32, %v1268_v32  ;;  %v192_v39 = vmul.f32 %v1271_v33, %v1271_v33 }
  0x27   : > { %v289_v19 = vsel %vm210_vm0, %v204_v13, 0.0  ;;  %v250_v26 = vsel %vm210_vm0, %v191_v20, 0.0  ;;  %v247_v27 = vsel %vm210_vm0, %v190_v21, 0.0 }
  0x28   : > { %269 = vadd.xlane.f32.xlu1 %v268_v24  ;;  %v1256_v24 = vld [vmem:[%s1096_s25 + $0xe8] sm:$0xff]  ;;  %v256_v44 = vsel %vm210_vm0, %v193_v38, 0.0  ;;  %v253_v45 = vsel %vm210_vm0, %v192_v39, 0.0 }
  0x29   : > { %266 = vadd.xlane.f32.xlu0 %v265_v25  ;;  %v1259_v25 = vld [vmem:[%s1096_s25 + $0xe0] sm:$0xff] }
  0x2c   : > { %227 = vadd.xlane.f32.xlu1 %v226_v30  ;;  %v207_v30 = vmul.f32 %v1256_v24, %v1256_v24 }
  0x2d   : > { %224 = vadd.xlane.f32.xlu0 %v223_v31  ;;  %v206_v31 = vmul.f32 %v1259_v25, %v1259_v25 }
  0x30   : > { %275 = vadd.xlane.f32.xlu1 %v274_v36  ;;  %v298_v36 = vsel %vm210_vm0, %v207_v30, 0.0 }
  0x31   : > { %272 = vadd.xlane.f32.xlu0 %v271_v37  ;;  %v295_v37 = vsel %vm210_vm0, %v206_v31, 0.0 }
  0x34   : > { %233 = vadd.xlane.f32.xlu1 %v232_v42  ;;  %v1280_v42 = vld [vmem:[%s1096_s25 + $0xf8] sm:$0xff] }
  0x35   : > { %230 = vadd.xlane.f32.xlu0 %v229_v43  ;;  %v1283_v43 = vld [vmem:[%s1096_s25 + $0xf0] sm:$0xff] }
  0x38   : > { %281 = vadd.xlane.f32.xlu1 %v280_v48  ;;  %v209_v48 = vmul.f32 %v1280_v42, %v1280_v42 }
  0x39   : > { %278 = vadd.xlane.f32.xlu0 %v277_v49  ;;  %v208_v49 = vmul.f32 %v1283_v43, %v1283_v43 }
  0x3a   : > { %v304_v50 = vsel %vm210_vm0, %v209_v48, 0.0 }
  0x3b   : > { %v301_v51 = vsel %vm210_vm0, %v208_v49, 0.0 }
  0x3c   : > { %239 = vadd.xlane.f32.xlu1 %v238_v54 }
  0x3d   : > { %236 = vadd.xlane.f32.xlu0 %v235_v55 }
  0x40   : > { %287 = vadd.xlane.f32.xlu1 %v286_v60 }
  0x41   : > { %284 = vadd.xlane.f32.xlu0 %v283_v61 }
  0x44   : > { %245 = vadd.xlane.f32.xlu1 %v244_v10 }
  0x45   : > { %242 = vadd.xlane.f32.xlu0 %v241_v11 }
  0x48   : > { %293 = vadd.xlane.f32.xlu1 %v292_v18 }
  0x49   : > { %290 = vadd.xlane.f32.xlu0 %v289_v19 }
  0x4c   : > { %251 = vadd.xlane.f32.xlu1 %v250_v26 }
  0x4d   : > { %248 = vadd.xlane.f32.xlu0 %v247_v27 }
  0x50   : > { %299 = vadd.xlane.f32.xlu1 %v298_v36 }
  0x51   : > { %296 = vadd.xlane.f32.xlu0 %v295_v37 }
  0x54   : > { %257 = vadd.xlane.f32.xlu1 %v256_v44 }
  0x55   : > { %254 = vadd.xlane.f32.xlu0 %v253_v45 }
  0x58   : > { %305 = vadd.xlane.f32.xlu1 %v304_v50 }
  0x59   : > { %302 = vadd.xlane.f32.xlu0 %v301_v51 }
  0xa9   : > { %v261_v54 = vpop.xlane.xlu1 %260 }
  0xaa   : > { %v213_v55 = vpop.xlane.xlu0 %212  ;;  %898 = vrsqrt.f32 %v261_v54  ;;  %vm323_vm3 = vcmp.eq.f32.partialorder %v261_v54, 0.0 }
  0xab   : > { %900 = vrsqrt.f32 %v213_v55  ;;  %vm307_vm2 = vcmp.eq.f32.partialorder %v213_v55, 0.0 }
  0xad   : > { %v264_v56 = vpop.xlane.xlu1 %263 }
  0xae   : > { %v216_v57 = vpop.xlane.xlu0 %215  ;;  %902 = vrsqrt.f32 %v264_v56  ;;  %vm324_vm4 = vcmp.eq.f32.partialorder %v264_v56, 0.0 }
  0xaf   : > { %904 = vrsqrt.f32 %v216_v57  ;;  %vm308_vm5 = vcmp.eq.f32.partialorder %v216_v57, 0.0 }
  0xb1   : > { %v222_v60 = vpop.xlane.xlu1 %221 }
  0xb2   : > { %v219_v61 = vpop.xlane.xlu0 %218  ;;  %906 = vrsqrt.f32 %v222_v60  ;;  %vm310_vm6 = vcmp.eq.f32.partialorder %v222_v60, 0.0 }
  0xb3   : > { %908 = vrsqrt.f32 %v219_v61  ;;  %vm309_vm7 = vcmp.eq.f32.partialorder %v219_v61, 0.0 }
  0xb4   : > { %v899_v62 = vpop.eup %898 }
  0xb5   : > { %v901_v63 = vpop.eup %900  ;;  %v270_v5 = vpop.xlane.xlu1 %269  ;;  %v387_v12 = vsel %vm323_vm3, 1.0, %v899_v62 }
  0xb6   : > { %v267_v7 = vpop.xlane.xlu0 %266  ;;  %910 = vrsqrt.f32 %v270_v5  ;;  %v371_v10 = vsel %vm307_vm2, 1.0, %v901_v63  ;;  %v420_v30 = vmul.f32 %v387_v12, %v1099_v0  ;;  %vm326_vm8 = vcmp.eq.f32.partialorder %v270_v5, 0.0 }
  0xb7   : > { %912 = vrsqrt.f32 %v267_v7  ;;  %v404_v26 = vmul.f32 %v371_v10, %v1102_v1  ;;  %vm325_vm9 = vcmp.eq.f32.partialorder %v267_v7, 0.0 }
  0xb8   : > { %v903_v11 = vpop.eup %902 }
  0xb9   : > { %v905_v13 = vpop.eup %904  ;;  %v388_v18 = vsel %vm324_vm4, 1.0, %v903_v11  ;;  %v228_v19 = vpop.xlane.xlu1 %227 }
  0xba   : > { %v225_v20 = vpop.xlane.xlu0 %224  ;;  %v372_v21 = vsel %vm308_vm5, 1.0, %v905_v13  ;;  %914 = vrsqrt.f32 %v228_v19  ;;  %v421_v31 = vmul.f32 %v388_v18, %v1105_v2  ;;  %vm312_vm10 = vcmp.eq.f32.partialorder %v228_v19, 0.0 }
  0xbb   : > { %916 = vrsqrt.f32 %v225_v20  ;;  %v405_v27 = vmul.f32 %v372_v21, %v1114_v6  ;;  %vm311_vm11 = vcmp.eq.f32.partialorder %v225_v20, 0.0 }
  0xbc   : > { %v907_v36 = vpop.eup %906  ;;  %v444_v48 = vpack.c.bf16 %v421_v31, %v420_v30 }
  0xbd   : > { %v909_v37 = vpop.eup %908  ;;  %v374_v38 = vsel %vm310_vm6, 1.0, %v907_v36  ;;  %v276_v39 = vpop.xlane.xlu1 %275  ;;  %v436_v45 = vpack.c.bf16 %v405_v27, %v404_v26 }
  0xbe   : > { %v273_v44 = vpop.xlane.xlu0 %272  ;;  %v407_v49 = vmul.f32 %v374_v38, %v1119_v8  ;;  %v373_v50 = vsel %vm309_vm7, 1.0, %v909_v37  ;;  %918 = vrsqrt.f32 %v276_v39  ;;  %837 = vmatprep.mubr.msk.bf16.mxu1 %vm210_vm0, %v444_v48  ;;  %vm328_vm12 = vcmp.eq.f32.partialorder %v276_v39, 0.0 }
  0xbf   : > { %v406_v1 = vmul.f32 %v373_v50, %v1122_v9  ;;  %920 = vrsqrt.f32 %v273_v44  ;;  %821 = vmatprep.mubr.msk.bf16.mxu0 %vm210_vm0, %v436_v45  ;;  %vm327_vm13 = vcmp.eq.f32.partialorder %v273_v44, 0.0 }
  0xc0   : > { %v911_v0 = vpop.eup %910 }
  0xc1   : > { %v913_v2 = vpop.eup %912  ;;  %v437_v6 = vpack.c.bf16 %v407_v49, %v406_v1  ;;  %v390_v51 = vsel %vm326_vm8, 1.0, %v911_v0  ;;  %v234_v54 = vpop.xlane.xlu1 %233 }
  0xc2   : > { %v231_v55 = vpop.xlane.xlu0 %230  ;;  %v423_v56 = vmul.f32 %v390_v51, %v1133_v16  ;;  %v389_v8 = vsel %vm325_vm9, 1.0, %v913_v2  ;;  %922 = vrsqrt.f32 %v234_v54  ;;  %vm314_vm14 = vcmp.eq.f32.partialorder %v234_v54, 0.0 }
  0xc3   : > { %v422_v57 = vmul.f32 %v389_v8, %v1136_v17  ;;  %924 = vrsqrt.f32 %v231_v55  ;;  %822 = vmatmul.mubr.msk.bf16.vlgmr.msra.gmra.mrb[0].mxu0 %vm210_vm0, %v437_v6  ;;  %vm313_vm15 = vcmp.eq.f32.partialorder %v231_v55, 0.0 }
  0xc4   : > { %v915_v9 = vpop.eup %914 }
  0xc5   : > { %v917_v60 = vpop.eup %916  ;;  %v445_v61 = vpack.c.bf16 %v423_v56, %v422_v57  ;;  %v376_v62 = vsel %vm312_vm10, 1.0, %v915_v9  ;;  %v282_v63 = vpop.xlane.xlu1 %281 }
  0xc6   : > { %v279_v5 = vpop.xlane.xlu0 %278  ;;  %v409_v7 = vmul.f32 %v376_v62, %v1145_v22  ;;  %v375_v10 = vsel %vm311_vm11, 1.0, %v917_v60  ;;  %926 = vrsqrt.f32 %v282_v63  ;;  %vm330_vm1 = vcmp.eq.f32.partialorder %v282_v63, 0.0 }
  0xc7   : > { %v408_v16 = vmul.f32 %v375_v10, %v1148_v23  ;;  %928 = vrsqrt.f32 %v279_v5  ;;  %838 = vmatmul.mubr.msk.bf16.vlgmr.msra.gmra.mrb[0].mxu1 %vm210_vm0, %v445_v61  ;;  %vm329_vm2 = vcmp.eq.f32.partialorder %v279_v5, 0.0 }
  0xc8   : > { %v919_v17 = vpop.eup %918 }
  0xc9   : > { %v921_v11 = vpop.eup %920  ;;  %v438_v12 = vpack.c.bf16 %v409_v7, %v408_v16  ;;  %v392_v13 = vsel %vm328_vm12, 1.0, %v919_v17  ;;  %v240_v18 = vpop.xlane.xlu1 %239 }
  0xca   : > { %v237_v19 = vpop.xlane.xlu0 %236  ;;  %v425_v20 = vmul.f32 %v392_v13, %v1157_v28  ;;  %v391_v21 = vsel %vm327_vm13, 1.0, %v921_v11  ;;  %930 = vrsqrt.f32 %v240_v18  ;;  %vm316_vm3 = vcmp.eq.f32.partialorder %v240_v18, 0.0 }
  0xcb   : > { %v424_v22 = vmul.f32 %v391_v21, %v1160_v29  ;;  %932 = vrsqrt.f32 %v237_v19  ;;  %825 = vmatprep.mubr.msk.bf16.mxu0 %vm210_vm0, %v438_v12  ;;  %vm315_vm4 = vcmp.eq.f32.partialorder %v237_v19, 0.0 }
  0xcc   : > { %v923_v23 = vpop.eup %922 }
  0xcd   : > { %v925_v26 = vpop.eup %924  ;;  %v446_v27 = vpack.c.bf16 %v425_v20, %v424_v22  ;;  %v378_v30 = vsel %vm314_vm14, 1.0, %v923_v23  ;;  %v288_v31 = vpop.xlane.xlu1 %287 }
  0xce   : > { %v285_v36 = vpop.xlane.xlu0 %284  ;;  %v411_v37 = vmul.f32 %v378_v30, %v1169_v34  ;;  %v377_v38 = vsel %vm313_vm15, 1.0, %v925_v26  ;;  %934 = vrsqrt.f32 %v288_v31  ;;  %vm332_vm5 = vcmp.eq.f32.partialorder %v288_v31, 0.0 }
  0xcf   : > { %v410_v28 = vmul.f32 %v377_v38, %v1172_v35  ;;  %936 = vrsqrt.f32 %v285_v36  ;;  %841 = vmatprep.mubr.msk.bf16.mxu1 %vm210_vm0, %v446_v27  ;;  %vm331_vm6 = vcmp.eq.f32.partialorder %v285_v36, 0.0 }
  0xd0   : > { %v927_v29 = vpop.eup %926 }
  0xd1   : > { %v929_v39 = vpop.eup %928  ;;  %v439_v44 = vpack.c.bf16 %v411_v37, %v410_v28  ;;  %v394_v45 = vsel %vm330_vm1, 1.0, %v927_v29  ;;  %v246_v48 = vpop.xlane.xlu1 %245 }
  0xd2   : > { %v243_v49 = vpop.xlane.xlu0 %242  ;;  %v427_v50 = vmul.f32 %v394_v45, %v1181_v40  ;;  %v393_v1 = vsel %vm329_vm2, 1.0, %v929_v39  ;;  %938 = vrsqrt.f32 %v246_v48  ;;  %vm318_vm7 = vcmp.eq.f32.partialorder %v246_v48, 0.0 }
  0xd3   : > { %v426_v34 = vmul.f32 %v393_v1, %v1184_v41  ;;  %940 = vrsqrt.f32 %v243_v49  ;;  %826 = vmatmul.mubr.msk.bf16.gmra.mrb[4].mxu0 %vm210_vm0, %v439_v44  ;;  %vm317_vm8 = vcmp.eq.f32.partialorder %v243_v49, 0.0 }
  0xd4   : > { %v931_v35 = vpop.eup %930 }
  0xd5   : > { %v933_v0 = vpop.eup %932  ;;  %v447_v2 = vpack.c.bf16 %v427_v50, %v426_v34  ;;  %v380_v6 = vsel %vm316_vm3, 1.0, %v931_v35  ;;  %v294_v51 = vpop.xlane.xlu1 %293 }
  0xd6   : > { %v291_v54 = vpop.xlane.xlu0 %290  ;;  %v413_v55 = vmul.f32 %v380_v6, %v1193_v46  ;;  %v379_v56 = vsel %vm315_vm4, 1.0, %v933_v0  ;;  %942 = vrsqrt.f32 %v294_v51  ;;  %vm334_vm9 = vcmp.eq.f32.partialorder %v294_v51, 0.0 }
  0xd7   : > { %v412_v40 = vmul.f32 %v379_v56, %v1196_v47  ;;  %944 = vrsqrt.f32 %v291_v54  ;;  %842 = vmatmul.mubr.msk.bf16.gmra.mrb[4].mxu1 %vm210_vm0, %v447_v2  ;;  %vm333_vm10 = vcmp.eq.f32.partialorder %v291_v54, 0.0 }
  0xd8   : > { %v935_v41 = vpop.eup %934 }
  0xd9   : > { %v937_v8 = vpop.eup %936  ;;  %v440_v57 = vpack.c.bf16 %v413_v55, %v412_v40  ;;  %v396_v9 = vsel %vm332_vm5, 1.0, %v935_v41  ;;  %v252_v60 = vpop.xlane.xlu1 %251 }
  0xda   : > { %v249_v61 = vpop.xlane.xlu0 %248  ;;  %v429_v62 = vmul.f32 %v396_v9, %v1205_v52  ;;  %v395_v63 = vsel %vm331_vm6, 1.0, %v937_v8  ;;  %946 = vrsqrt.f32 %v252_v60  ;;  %vm320_vm11 = vcmp.eq.f32.partialorder %v252_v60, 0.0 }
  0xdb   : > { %v428_v46 = vmul.f32 %v395_v63, %v1208_v53  ;;  %948 = vrsqrt.f32 %v249_v61  ;;  %829 = vmatprep.mubr.msk.bf16.mxu0 %vm210_vm0, %v440_v57  ;;  %vm319_vm12 = vcmp.eq.f32.partialorder %v249_v61, 0.0 }
  0xdc   : > { %v939_v47 = vpop.eup %938 }
  0xdd   : > { %v941_v5 = vpop.eup %940  ;;  %v448_v7 = vpack.c.bf16 %v429_v62, %v428_v46  ;;  %v382_v10 = vsel %vm318_vm7, 1.0, %v939_v47  ;;  %v300_v16 = vpop.xlane.xlu1 %299 }
  0xde   : > { %v297_v17 = vpop.xlane.xlu0 %296  ;;  %v415_v11 = vmul.f32 %v382_v10, %v1217_v58  ;;  %v381_v12 = vsel %vm317_vm8, 1.0, %v941_v5  ;;  %950 = vrsqrt.f32 %v300_v16  ;;  %vm336_vm13 = vcmp.eq.f32.partialorder %v300_v16, 0.0 }
  0xdf   : > { %v414_v52 = vmul.f32 %v381_v12, %v1220_v59  ;;  %952 = vrsqrt.f32 %v297_v17  ;;  %845 = vmatprep.mubr.msk.bf16.mxu1 %vm210_vm0, %v448_v7  ;;  %vm335_vm14 = vcmp.eq.f32.partialorder %v297_v17, 0.0 }
  0xe0   : > { %v943_v53 = vpop.eup %942 }
  0xe1   : > { %v945_v13 = vpop.eup %944  ;;  %v441_v18 = vpack.c.bf16 %v415_v11, %v414_v52  ;;  %v398_v19 = vsel %vm334_vm9, 1.0, %v943_v53  ;;  %v258_v20 = vpop.xlane.xlu1 %257 }
  0xe2   : > { %v255_v21 = vpop.xlane.xlu0 %254  ;;  %v431_v22 = vmul.f32 %v398_v19, %v1229_v3  ;;  %v397_v23 = vsel %vm333_vm10, 1.0, %v945_v13  ;;  %954 = vrsqrt.f32 %v258_v20  ;;  %vm322_vm15 = vcmp.eq.f32.partialorder %v258_v20, 0.0 }
  0xe3   : > { %v430_v58 = vmul.f32 %v397_v23, %v1232_v4  ;;  %956 = vrsqrt.f32 %v255_v21  ;;  %830 = vmatmul.mubr.msk.bf16.gmra.mrb[8].mxu0 %vm210_vm0, %v441_v18  ;;  %vm321_vm1 = vcmp.eq.f32.partialorder %v255_v21, 0.0 }
  0xe4   : > { %v947_v59 = vpop.eup %946 }
  0xe5   : > { %v949_v26 = vpop.eup %948  ;;  %v449_v27 = vpack.c.bf16 %v431_v22, %v430_v58  ;;  %v384_v30 = vsel %vm320_vm11, 1.0, %v947_v59  ;;  %v306_v31 = vpop.xlane.xlu1 %305 }
  0xe6   : > { %v303_v36 = vpop.xlane.xlu0 %302  ;;  %v417_v37 = vmul.f32 %v384_v30, %v1244_v14  ;;  %v383_v38 = vsel %vm319_vm12, 1.0, %v949_v26  ;;  %958 = vrsqrt.f32 %v306_v31  ;;  %vm338_vm2 = vcmp.eq.f32.partialorder %v306_v31, 0.0 }
  0xe7   : > { %v416_v3 = vmul.f32 %v383_v38, %v1247_v15  ;;  %960 = vrsqrt.f32 %v303_v36  ;;  %846 = vmatmul.mubr.msk.bf16.gmra.mrb[8].mxu1 %vm210_vm0, %v449_v27  ;;  %vm337_vm3 = vcmp.eq.f32.partialorder %v303_v36, 0.0 }
  0xe8   : > { %v951_v4 = vpop.eup %950 }
  0xe9   : > { %v953_v28 = vpop.eup %952  ;;  %v442_v29 = vpack.c.bf16 %v417_v37, %v416_v3  ;;  %v400_v39 = vsel %vm336_vm13, 1.0, %v951_v4 }
  0xea   : > { %v433_v44 = vmul.f32 %v400_v39, %v1256_v24  ;;  %v399_v45 = vsel %vm335_vm14, 1.0, %v953_v28 }
  0xeb   : > { %v432_v48 = vmul.f32 %v399_v45, %v1259_v25  ;;  %833 = vmatprep.mubr.msk.bf16.mxu0 %vm210_vm0, %v442_v29 }
  0xec   : > { %v955_v14 = vpop.eup %954 }
  0xed   : > { %v957_v49 = vpop.eup %956  ;;  %v450_v15 = vpack.c.bf16 %v433_v44, %v432_v48  ;;  %v386_v50 = vsel %vm322_vm15, 1.0, %v955_v14 }
  0xee   : > { %v419_v1 = vmul.f32 %v386_v50, %v1268_v32  ;;  %v385_v34 = vsel %vm321_vm1, 1.0, %v957_v49 }
  0xef   : > { %v418_v35 = vmul.f32 %v385_v34, %v1271_v33  ;;  %849 = vmatprep.mubr.msk.bf16.mxu1 %vm210_vm0, %v450_v15 }
  0xf0   : > { %v959_v24 = vpop.eup %958 }
  0xf1   : > { %v961_v25 = vpop.eup %960  ;;  %v443_v0 = vpack.c.bf16 %v419_v1, %v418_v35  ;;  %v402_v2 = vsel %vm338_vm2, 1.0, %v959_v24 }
  0xf2   : > { %v435_v6 = vmul.f32 %v402_v2, %v1280_v42  ;;  %v401_v51 = vsel %vm337_vm3, 1.0, %v961_v25 }
  0xf3   : > { %v434_v54 = vmul.f32 %v401_v51, %v1283_v43  ;;  %834 = vmatmul.mubr.msk.bf16.gmra.mrb[12].mxu0 %vm210_vm0, %v443_v0 }
  0xf5   : > { %v451_v32 = vpack.c.bf16 %v435_v6, %v434_v54 }
  0xf7   : > { %850 = vmatmul.mubr.msk.bf16.gmra.mrb[12].mxu1 %vm210_vm0, %v451_v32 }
 0x196   : > { %v823_v33 = vpop.f32.mrb[0].mxu0 }
 0x197   : > { %667 = vst [vmem:[%s1344_s30 + $0x10] sm:$0xff] %v823_v33  ;;  %v538_v42 = vpop.f32.mrb[1].mxu0 }
 0x198   : > { %665 = vst [vmem:[%s1344_s30] sm:$0xff] %v538_v42  ;;  %v824_v43 = vpop.f32.mrb[2].mxu0 }
 0x199   : > { %668 = vst [vmem:[%s1344_s30 + $0x18] sm:$0xff] %v824_v43  ;;  %v541_v55 = vpop.f32.mrb[3].mxu0 }
 0x19a   : > { %666 = vst [vmem:[%s1344_s30 + $0x8] sm:$0xff] %v541_v55  ;;  %v839_v56 = vpop.f32.mrb[0].mxu1 }
 0x19b   : > { %683 = vst [vmem:[%s1344_s30 + $0x90] sm:$0xff] %v839_v56  ;;  %v602_v40 = vpop.f32.mrb[1].mxu1 }
 0x19c   : > { %681 = vst [vmem:[%s1344_s30 + $0x80] sm:$0xff] %v602_v40  ;;  %v840_v41 = vpop.f32.mrb[2].mxu1 }
 0x19d   : > { %684 = vst [vmem:[%s1344_s30 + $0x98] sm:$0xff] %v840_v41  ;;  %v605_v8 = vpop.f32.mrb[3].mxu1 }
 0x19e   : > { %682 = vst [vmem:[%s1344_s30 + $0x88] sm:$0xff] %v605_v8 }
 0x1a6   : > { %v827_v57 = vpop.f32.mrb[4].mxu0 }
 0x1a7   : > { %671 = vst [vmem:[%s1344_s30 + $0x30] sm:$0xff] %v827_v57  ;;  %v554_v9 = vpop.f32.mrb[5].mxu0 }
 0x1a8   : > { %669 = vst [vmem:[%s1344_s30 + $0x20] sm:$0xff] %v554_v9  ;;  %v828_v60 = vpop.f32.mrb[6].mxu0 }
 0x1a9   : > { %672 = vst [vmem:[%s1344_s30 + $0x38] sm:$0xff] %v828_v60  ;;  %v557_v61 = vpop.f32.mrb[7].mxu0 }
 0x1aa   : > { %670 = vst [vmem:[%s1344_s30 + $0x28] sm:$0xff] %v557_v61  ;;  %v843_v62 = vpop.f32.mrb[4].mxu1 }
 0x1ab   : > { %687 = vst [vmem:[%s1344_s30 + $0xb0] sm:$0xff] %v843_v62  ;;  %v618_v63 = vpop.f32.mrb[5].mxu1 }
 0x1ac   : > { %685 = vst [vmem:[%s1344_s30 + $0xa0] sm:$0xff] %v618_v63  ;;  %v844_v46 = vpop.f32.mrb[6].mxu1 }
 0x1ad   : > { %688 = vst [vmem:[%s1344_s30 + $0xb8] sm:$0xff] %v844_v46  ;;  %v621_v47 = vpop.f32.mrb[7].mxu1 }
 0x1ae   : > { %686 = vst [vmem:[%s1344_s30 + $0xa8] sm:$0xff] %v621_v47 }
 0x1b6   : > { %v831_v5 = vpop.f32.mrb[8].mxu0 }
 0x1b7   : > { %675 = vst [vmem:[%s1344_s30 + $0x50] sm:$0xff] %v831_v5  ;;  %v570_v7 = vpop.f32.mrb[9].mxu0 }
 0x1b8   : > { %673 = vst [vmem:[%s1344_s30 + $0x40] sm:$0xff] %v570_v7  ;;  %v832_v10 = vpop.f32.mrb[10].mxu0 }
 0x1b9   : > { %676 = vst [vmem:[%s1344_s30 + $0x58] sm:$0xff] %v832_v10  ;;  %v573_v16 = vpop.f32.mrb[11].mxu0 }
 0x1ba   : > { %674 = vst [vmem:[%s1344_s30 + $0x48] sm:$0xff] %v573_v16  ;;  %v847_v17 = vpop.f32.mrb[8].mxu1 }
 0x1bb   : > { %691 = vst [vmem:[%s1344_s30 + $0xd0] sm:$0xff] %v847_v17  ;;  %v634_v11 = vpop.f32.mrb[9].mxu1 }
 0x1bc   : > { %689 = vst [vmem:[%s1344_s30 + $0xc0] sm:$0xff] %v634_v11  ;;  %v848_v12 = vpop.f32.mrb[10].mxu1 }
 0x1bd   : > { %692 = vst [vmem:[%s1344_s30 + $0xd8] sm:$0xff] %v848_v12  ;;  %v637_v52 = vpop.f32.mrb[11].mxu1 }
 0x1be   : > { %690 = vst [vmem:[%s1344_s30 + $0xc8] sm:$0xff] %v637_v52 }
 0x1c6   : > { %v835_v53 = vpop.f32.mrb[12].mxu0 }
 0x1c7   : > { %679 = vst [vmem:[%s1344_s30 + $0x70] sm:$0xff] %v835_v53  ;;  %v586_v13 = vpop.f32.mrb[13].mxu0 }
 0x1c8   : > { %677 = vst [vmem:[%s1344_s30 + $0x60] sm:$0xff] %v586_v13  ;;  %v836_v18 = vpop.f32.mrb[14].mxu0 }
 0x1c9   : > { %680 = vst [vmem:[%s1344_s30 + $0x78] sm:$0xff] %v836_v18  ;;  %v589_v19 = vpop.f32.mrb[15].mxu0 }
 0x1ca   : > { %678 = vst [vmem:[%s1344_s30 + $0x68] sm:$0xff] %v589_v19  ;;  %v851_v20 = vpop.f32.mrb[12].mxu1 }
 0x1cb   : > { %695 = vst [vmem:[%s1344_s30 + $0xf0] sm:$0xff] %v851_v20  ;;  %v650_v21 = vpop.f32.mrb[13].mxu1 }
 0x1cc   : > { %693 = vst [vmem:[%s1344_s30 + $0xe0] sm:$0xff] %v650_v21  ;;  %v852_v22 = vpop.f32.mrb[14].mxu1 }
 0x1cd   : > { %696 = vst [vmem:[%s1344_s30 + $0xf8] sm:$0xff] %v852_v22  ;;  %v653_v23 = vpop.f32.mrb[15].mxu1 }
 0x1ce   : > { %694 = vst [vmem:[%s1344_s30 + $0xe8] sm:$0xff] %v653_v23 }
 0x1cf   : > { %975 = shalt.err (!%p972_p3)
}
 0x1d0   : > { %s976_s21 = scalar_lea.hbm %s1380_s7, 4096  ;;  %s980_s24 = scalar_lea.hbm %s1432_s2, 8192 }
 0x1d1   : > { %p977_p4 = scmp.ne.s32.totalorder %s1380_s7, %s976_s21  ;;  %p981_p9 = scmp.lt.u32.totalorder %s1380_s7, %s1432_s2 }
 0x1d2   : > { %p982_p10 = scmp.lt.u32.totalorder %s980_s24, %s976_s21  ;;  %p984_p12 = scmp.lt.u32.totalorder %s976_s21, %s1380_s7 }
 0x1d3   : > { %p978_p7 = pnand %p977_p4, %p1082_p5 }
 0x1d4   : > { %p983_p11 = por %p982_p10, %p981_p9 }
 0x1d5   : > { %p979_p8 = pneg %p978_p7 }
 0x1d6   : > { %p985_p13 = por %p984_p12, %p983_p11 }
 0x1d8   : > { %p986_p0 = pnand %p985_p13, %p979_p8 }
 0x1da   : > { %989 = shalt.err (!%p986_p0)
}
 0x1db   : > { %s1027_s27 = smov 128   ;;  %s1028_s28 = smov 8  }
 0x1dc   : > { %857 = dma.vmem_to_hbm [thread:$0]  (%p1082_p5), %s1382_s4, 4096, %s1380_s7, %s1389_s8, %s1027_s27, %s1027_s27, %s1028_s28  }
 0x1dd PF: > { %p863_p1 = scmp.ge.s32.totalorder %s1024_s12, 2  ;;  %s726_s29 = sand.u32 1, %s1012_s9  }
 0x1de   : > { %s727_s30 = scalar_lea.sflag [#allocation3], %s726_s29 }
 0x1df   : > { %p860_p2 = pnand %p863_p1, %p1086_p6 }
 0x1e1   : > { %1007 = dma.done.wait (!%p860_p2), %s727_s30, 4096  }
 0x1e2   : > { %1009 = vsyncadd (!%p860_p2), %s727_s30, 4294963200  ;;  %p12_p3 = scmp.ge.s32.totalorder %s1069_s15, 4   ;;  %s1435_s9 = smov %s1016_s10 }
 0x1e3   : > { %s1436_s10 = smov %s1020_s11  ;;  %s1437_s11 = smov %s1080_s18 }
 0x1e4   : > { %s1438_s12 = smov %s1069_s15  ;;  %14 = sbr.rel (!%p12_p3) target bundleno = 3 (0x3), region = 63 }
 0x1eb   :  { %732 = vsyncpa [#allocation3], 1 }
 0x1ec   :  { %734 = vsyncpa [#allocation3 + $0x1], 1 }

</bundles_post_ra>
